<compile_context>
chip_gen: v6e
topology: v6e:2x2x1
jax: 0.10.0
libtpu: 0.0.40
codegen_flags: <defaults>
</compile_context>

<pallas_src>
import jax
import jax.numpy as jnp
from jax import lax
from jax.experimental import pallas as pl
from jax.experimental.pallas import tpu as pltpu

EPS = 1e-5


def _rain_kernel(x_ref, r_ref, p_ref, o_ref):
    """One (batch, channel-block) tile.

    x_ref: (1, BC, HW)  activations (wire dtype)
    r_ref: (1, 3,  HW)  reduction rows [1, m, m^2] (wire dtype)
    p_ref: (C, 4)       per-channel params, resident once in VMEM (f32)
    o_ref: (1, BC, HW)
    """
    bc = x_ref.shape[1]
    hw = float(x_ref.shape[2])

    x = x_ref[0]                                # (BC, HW)  wire dtype, no eager f32 cast
    rows = r_ref[0]                             # (3,  HW)  [ones, m, m^2]

    # Per-channel params for this channel block (whole table fetched once).
    if p_ref.shape[0] == bc:
        p = p_ref[...]
    else:
        start = pl.multiple_of(pl.program_id(1) * bc, bc)
        p = p_ref[pl.ds(start, bc), :]          # (BC, 4) f32
    g1_f, b_f0 = p[:, 0:1], p[:, 1:2]           # 1 + fg_gamma, fg_beta
    g1_b, b_b0 = p[:, 2:3], p[:, 3:4]           # 1 + bg_gamma, bg_beta

    # ---- MXU reductions: one-pass weighted moments, f32 accumulation --------
    # s1 = [sum x, sum m x, sum m^2 x], s2 = same with x^2  -> (BC, 3)
    dims = (((1,), (1,)), ((), ()))             # contract last dims (A @ B^T)
    s1 = lax.dot_general(x, rows, dims, preferred_element_type=jnp.float32)
    x2 = x * x                                  # only extra per-element VPU op
    s2 = lax.dot_general(x2, rows, dims, preferred_element_type=jnp.float32)
    sx, smx, sm2x = s1[:, 0:1], s1[:, 1:2], s1[:, 2:3]
    sxx, smxx, sm2xx = s2[:, 0:1], s2[:, 1:2], s2[:, 2:3]

    # Mask-only scalars: tiny (1, HW) reductions (exact, f32).
    m_f32 = rows[1:2, :].astype(jnp.float32)
    m2_f32 = rows[2:3, :].astype(jnp.float32)
    num_f = jnp.sum(m_f32, axis=-1, keepdims=True)        # (1, 1)  sum m
    sm2 = jnp.sum(m2_f32, axis=-1, keepdims=True)         # (1, 1)  sum m^2
    num_b = hw - num_f                                     # sum (1 - m)
    sw2 = hw - 2.0 * num_f + sm2                           # sum (1 - m)^2

    # ---- per-channel stats (BC, 1), PyTorch weighting exactly ---------------
    mean_f = smx / (num_f + EPS)
    mean_b = (sx - smx) / (num_b + EPS)
    # ss_f = sum m^2 (x - mean_f)^2 ; ss_b = sum (1-m)^2 (x - mean_b)^2
    ss_f = sm2xx - 2.0 * mean_f * sm2x + mean_f * mean_f * sm2
    swx = sx - 2.0 * smx + sm2x                            # sum (1-m)^2 x
    swxx = sxx - 2.0 * smxx + sm2xx                        # sum (1-m)^2 x^2
    ss_b = swxx - 2.0 * mean_b * swx + mean_b * mean_b * sw2
    var_f = jnp.maximum(ss_f, 0.0) / (num_f + EPS)         # clamp one-pass cancellation
    var_b = jnp.maximum(ss_b, 0.0) / (num_b + EPS)
    std_b = jnp.sqrt(var_b + EPS)
    inv_std_f = lax.rsqrt(var_f + EPS)

    # ---- fold all per-channel work into:  out = x*a_b + o_b + m*(x*da + db) --
    a_b = g1_b / std_b
    o_b = b_b0 - mean_b * a_b
    r = std_b * inv_std_f
    a_f = g1_f * r
    o_f = g1_f * (mean_b - mean_f * r) + b_f0
    da = a_f - a_b
    db = o_f - o_b

    # Affine tail in bf16 when the wire dtype is bf16 (v6e/v7x), else f32.
    ct = jnp.bfloat16 if x.dtype == jnp.bfloat16 else jnp.float32
    xc = x.astype(ct)                           # no-op when dtypes already match
    mc = rows[1:2, :].astype(ct)                # mask used exactly once below
    out = xc * a_b.astype(ct) + o_b.astype(ct) + mc * (xc * da.astype(ct) + db.astype(ct))
    o_ref[0] = out.astype(o_ref.dtype)


def _vmem_capacity_bytes():
    try:
        return int(pltpu.get_tpu_info().vmem_capacity_bytes)
    except Exception:
        return 64 << 20                          # conservative: v7x per-TensorCore VMEM


def _working_set_bytes(bc, C, HW, in_bytes):
    xio = bc * HW * in_bytes * 2 * 2             # x in + out tiles, double-buffered
    rows = 8 * HW * in_bytes * 2                 # (3, HW) rows tile (padded to 8 sublanes), 2 bufs
    tmp = bc * HW * 4 * 3                        # f32-equivalent compute temporaries
    return xio + rows + tmp + C * 4 * 4 * 2      # + resident (C, 4) param table


def _pick_block_c(C, HW, in_bytes):
    """Largest legal channel block whose working set fits a generation-aware budget."""
    budget = max(2 << 20, _vmem_capacity_bytes() // 12)
    legal = [d for d in range(1, C + 1) if C % d == 0 and (d == C or d % 8 == 0)]
    fitting = [d for d in legal if _working_set_bytes(d, C, HW, in_bytes) <= budget]
    bc = max(fitting) if fitting else min(legal)
    return bc, _working_set_bytes(bc, C, HW, in_bytes)


def rain_forward(x, mask, fg_gamma, fg_beta, bg_gamma, bg_beta):
    """x: (N, C, H, W); mask: (N, 1, Hm, Wm); params: (C,) each."""
    N, C, H, W = x.shape
    Hm, Wm = int(mask.shape[2]), int(mask.shape[3])

    # F.interpolate(mask, size=(H, W), mode='nearest'): src = floor(dst * in / out)
    hi = (jnp.arange(H) * Hm) // H
    wi = (jnp.arange(W) * Wm) // W
    m = mask[:, :, hi[:, None], wi[None, :]]                  # (N, 1, H, W)

    HW = H * W
    x3 = x.reshape(N, C, HW)                                  # unpadded: no pad/slice round trips
    m3 = m.reshape(N, 1, HW).astype(x.dtype)                  # narrow mask on the wire

    # (N, 3, HW) reduction rows [1, m, m^2] for the MXU-side weighted moments.
    rows = jnp.concatenate([jnp.ones_like(m3), m3, m3 * m3], axis=1).astype(x.dtype)

    # (C, 4) param table with (1 + gamma) pre-folded.
    params = jnp.stack(
        [1.0 + fg_gamma, fg_beta, 1.0 + bg_gamma, bg_beta], axis=-1
    ).astype(jnp.float32)

    in_bytes = jnp.dtype(x.dtype).itemsize
    bc, ws = _pick_block_c(C, HW, in_bytes)
    # Explicit scoped-VMEM limit sized from the working set; cap at 48 MiB so a
    # v5e/v6e-sized tiling stays safe on v7x's 64 MiB per-TensorCore VMEM.
    vmem_limit = int(min(48 << 20, max(32 << 20, int(1.5 * ws))))

    grid = (N, C // bc)   # batch outer, channel-block inner -> rows fetched once per batch

    out = pl.pallas_call(
        _rain_kernel,
        out_shape=jax.ShapeDtypeStruct((N, C, HW), x.dtype),
        grid_spec=pl.GridSpec(
            grid=grid,
            in_specs=[
                pl.BlockSpec((1, bc, HW), lambda n, c: (n, c, 0)),  # x tile
                pl.BlockSpec((1, 3, HW), lambda n, c: (n, 0, 0)),   # rows [1, m, m^2]
                pl.BlockSpec((C, 4), lambda n, c: (0, 0)),          # params, resident once
            ],
            out_specs=pl.BlockSpec((1, bc, HW), lambda n, c: (n, c, 0)),
        ),
        compiler_params=pltpu.CompilerParams(
            dimension_semantics=("parallel", "parallel"),
            vmem_limit_bytes=vmem_limit),
    )(x3, rows, params)

    return out.reshape(N, C, H, W)


def rain_reference(x, mask, fg_gamma, fg_beta, bg_gamma, bg_beta):
    """Pure-JAX reference mirroring the PyTorch module."""
    N, C, H, W = x.shape
    Hm, Wm = mask.shape[2], mask.shape[3]
    hi = (jnp.arange(H) * Hm) // H
    wi = (jnp.arange(W) * Wm) // W
    m = mask[:, :, hi[:, None], wi[None, :]]

    def stats(region, msk):
        s = jnp.sum(region, axis=(2, 3))
        n = jnp.sum(msk, axis=(2, 3))
        mu = s / (n + EPS)
        mean = mu[:, :, None, None]
        var = jnp.sum((region + (1 - msk) * mean - mean) ** 2, axis=(2, 3)) / (n + EPS)
        return mean, jnp.sqrt(var[:, :, None, None] + EPS)

    mean_b, std_b = stats(x * (1 - m), 1 - m)
    normalized = (x - mean_b) / std_b
    nb = (normalized * (1 + bg_gamma[None, :, None, None]) + bg_beta[None, :, None, None]) * (1 - m)
    mean_f, std_f = stats(x * m, m)
    normalized = (x - mean_f) / std_f * std_b + mean_b
    nf = (normalized * (1 + fg_gamma[None, :, None, None]) + fg_beta[None, :, None, None]) * m
    return nf + nb


if __name__ == "__main__":
    key = jax.random.PRNGKey(0)
    k_x, k_m, k_g1, k_b1, k_g2, k_b2 = jax.random.split(key, 6)

    N, C, H, W = 2, 4, 16, 16
    x = jax.random.normal(k_x, (N, C, H, W), dtype=jnp.float32)
    # Binary mask at half resolution (exercises the nearest-neighbor interpolate).
    mask = (jax.random.uniform(k_m, (N, 1, H // 2, W // 2)) > 0.5).astype(jnp.float32)

    fg_gamma = 0.1 * jax.random.normal(k_g1, (C,), dtype=jnp.float32)
    fg_beta = 0.1 * jax.random.normal(k_b1, (C,), dtype=jnp.float32)
    bg_gamma = 0.1 * jax.random.normal(k_g2, (C,), dtype=jnp.float32)
    bg_beta = 0.1 * jax.random.normal(k_b2, (C,), dtype=jnp.float32)

    out = rain_forward(x, mask, fg_gamma, fg_beta, bg_gamma, bg_beta)
    out = jax.block_until_ready(out)

    ref = rain_reference(x, mask, fg_gamma, fg_beta, bg_gamma, bg_beta)
    assert out.shape == (N, C, H, W)
    # Tolerance covers the MXU-accumulated one-pass moments (standard fused-norm tolerance).
    assert jnp.allclose(out, ref, atol=2e-3, rtol=2e-3), "mismatch vs JAX reference"
    assert bool(jnp.isfinite(out).all()), "non-finite output"

    print("KERNEL_OK")
</pallas_src>

<mosaic_0001>
module attributes {stable_mosaic.version = 11 : i64} {
  func.func @_rain_kernel(%arg0: i32, %arg1: i32, %arg2: memref<1x4x256xf32, #tpu.memory_space<vmem>>, %arg3: memref<1x3x256xf32, #tpu.memory_space<vmem>>, %arg4: memref<4x4xf32, #tpu.memory_space<vmem>>, %arg5: memref<1x4x256xf32, #tpu.memory_space<vmem>>) attributes {dimension_semantics = [#tpu.dimension_semantics<parallel>, #tpu.dimension_semantics<parallel>], iteration_bounds = array<i64: 2, 1>, scalar_prefetch = 0 : i64, scratch_operands = 0 : i64, tpu.core_type = #tpu.core_type<tc>, window_params = [{transform_indices = @transform_0, window_bounds = array<i64: 1, 4, 256>}, {transform_indices = @transform_1, window_bounds = array<i64: 1, 3, 256>}, {pipeline_mode = #tpu.pipeline_mode<synchronous>, transform_indices = @transform_2, window_bounds = array<i64: 4, 4>}, {transform_indices = @transform_3, window_bounds = array<i64: 1, 4, 256>}]} {
    %c0 = arith.constant 0 : index
    %c0_0 = arith.constant 0 : index
    %c0_1 = arith.constant 0 : index
    %0 = vector.load %arg2[%c0, %c0_0, %c0_1] : memref<1x4x256xf32, #tpu.memory_space<vmem>>, vector<1x4x256xf32>
    %1 = vector.shape_cast %0 : vector<1x4x256xf32> to vector<4x256xf32>
    %c0_2 = arith.constant 0 : index
    %c0_3 = arith.constant 0 : index
    %c0_4 = arith.constant 0 : index
    %2 = vector.load %arg3[%c0_2, %c0_3, %c0_4] : memref<1x3x256xf32, #tpu.memory_space<vmem>>, vector<1x3x256xf32>
    %3 = vector.shape_cast %2 : vector<1x3x256xf32> to vector<3x256xf32>
    %c0_5 = arith.constant 0 : index
    %c0_6 = arith.constant 0 : index
    %4 = vector.load %arg4[%c0_5, %c0_6] : memref<4x4xf32, #tpu.memory_space<vmem>>, vector<4x4xf32>
    %5 = vector.extract_strided_slice %4 {offsets = [0, 0], sizes = [4, 1], strides = [1, 1]} : vector<4x4xf32> to vector<4x1xf32>
    %6 = vector.extract_strided_slice %4 {offsets = [0, 1], sizes = [4, 1], strides = [1, 1]} : vector<4x4xf32> to vector<4x1xf32>
    %7 = vector.extract_strided_slice %4 {offsets = [0, 2], sizes = [4, 1], strides = [1, 1]} : vector<4x4xf32> to vector<4x1xf32>
    %8 = vector.extract_strided_slice %4 {offsets = [0, 3], sizes = [4, 1], strides = [1, 1]} : vector<4x4xf32> to vector<4x1xf32>
    %cst = arith.constant dense<0.000000e+00> : vector<4x3xf32>
    %9 = tpu.matmul %1, %3, %cst {dimension_numbers = #tpu.dot_dimension_numbers<[1], [1], [0], [0], [0, 0, 1, 0], [], []>} : vector<4x256xf32>, vector<3x256xf32>, vector<4x3xf32> -> vector<4x3xf32>
    %10 = arith.mulf %1, %1 : vector<4x256xf32>
    %cst_7 = arith.constant dense<0.000000e+00> : vector<4x3xf32>
    %11 = tpu.matmul %10, %3, %cst_7 {dimension_numbers = #tpu.dot_dimension_numbers<[1], [1], [0], [0], [0, 0, 1, 0], [], []>} : vector<4x256xf32>, vector<3x256xf32>, vector<4x3xf32> -> vector<4x3xf32>
    %12 = vector.extract_strided_slice %9 {offsets = [0, 0], sizes = [4, 1], strides = [1, 1]} : vector<4x3xf32> to vector<4x1xf32>
    %13 = vector.extract_strided_slice %9 {offsets = [0, 1], sizes = [4, 1], strides = [1, 1]} : vector<4x3xf32> to vector<4x1xf32>
    %14 = vector.extract_strided_slice %9 {offsets = [0, 2], sizes = [4, 1], strides = [1, 1]} : vector<4x3xf32> to vector<4x1xf32>
    %15 = vector.extract_strided_slice %11 {offsets = [0, 0], sizes = [4, 1], strides = [1, 1]} : vector<4x3xf32> to vector<4x1xf32>
    %16 = vector.extract_strided_slice %11 {offsets = [0, 1], sizes = [4, 1], strides = [1, 1]} : vector<4x3xf32> to vector<4x1xf32>
    %17 = vector.extract_strided_slice %11 {offsets = [0, 2], sizes = [4, 1], strides = [1, 1]} : vector<4x3xf32> to vector<4x1xf32>
    %18 = vector.extract_strided_slice %3 {offsets = [1, 0], sizes = [1, 256], strides = [1, 1]} : vector<3x256xf32> to vector<1x256xf32>
    %19 = vector.extract_strided_slice %3 {offsets = [2, 0], sizes = [1, 256], strides = [1, 1]} : vector<3x256xf32> to vector<1x256xf32>
    %cst_8 = arith.constant dense<0.000000e+00> : vector<1xf32>
    %20 = vector.multi_reduction <add>, %18, %cst_8 [1] : vector<1x256xf32> to vector<1xf32>
    %21 = vector.shape_cast %20 : vector<1xf32> to vector<1x1xf32>
    %cst_9 = arith.constant dense<0.000000e+00> : vector<1xf32>
    %22 = vector.multi_reduction <add>, %19, %cst_9 [1] : vector<1x256xf32> to vector<1xf32>
    %23 = vector.shape_cast %22 : vector<1xf32> to vector<1x1xf32>
    %cst_10 = arith.constant 2.560000e+02 : f32
    %24 = vector.broadcast %cst_10 : f32 to vector<1x1xf32>
    %25 = arith.subf %24, %21 : vector<1x1xf32>
    %cst_11 = arith.constant 2.000000e+00 : f32
    %26 = vector.broadcast %cst_11 : f32 to vector<1x1xf32>
    %27 = arith.mulf %26, %21 : vector<1x1xf32>
    %cst_12 = arith.constant 2.560000e+02 : f32
    %28 = vector.broadcast %cst_12 : f32 to vector<1x1xf32>
    %29 = arith.subf %28, %27 : vector<1x1xf32>
    %30 = arith.addf %29, %23 : vector<1x1xf32>
    %cst_13 = arith.constant 9.99999974E-6 : f32
    %31 = vector.broadcast %cst_13 : f32 to vector<1x1xf32>
    %32 = arith.addf %21, %31 : vector<1x1xf32>
    %33 = vector.broadcast %32 : vector<1x1xf32> to vector<4x1xf32>
    %34 = arith.divf %13, %33 : vector<4x1xf32>
    %35 = arith.subf %12, %13 : vector<4x1xf32>
    %cst_14 = arith.constant 9.99999974E-6 : f32
    %36 = vector.broadcast %cst_14 : f32 to vector<1x1xf32>
    %37 = arith.addf %25, %36 : vector<1x1xf32>
    %38 = vector.broadcast %37 : vector<1x1xf32> to vector<4x1xf32>
    %39 = arith.divf %35, %38 : vector<4x1xf32>
    %cst_15 = arith.constant 2.000000e+00 : f32
    %40 = vector.broadcast %cst_15 : f32 to vector<4x1xf32>
    %41 = arith.mulf %40, %34 : vector<4x1xf32>
    %42 = arith.mulf %41, %14 : vector<4x1xf32>
    %43 = arith.subf %17, %42 : vector<4x1xf32>
    %44 = arith.mulf %34, %34 : vector<4x1xf32>
    %45 = vector.broadcast %23 : vector<1x1xf32> to vector<4x1xf32>
    %46 = arith.mulf %44, %45 : vector<4x1xf32>
    %47 = arith.addf %43, %46 : vector<4x1xf32>
    %cst_16 = arith.constant 2.000000e+00 : f32
    %48 = vector.broadcast %cst_16 : f32 to vector<4x1xf32>
    %49 = arith.mulf %48, %13 : vector<4x1xf32>
    %50 = arith.subf %12, %49 : vector<4x1xf32>
    %51 = arith.addf %50, %14 : vector<4x1xf32>
    %cst_17 = arith.constant 2.000000e+00 : f32
    %52 = vector.broadcast %cst_17 : f32 to vector<4x1xf32>
    %53 = arith.mulf %52, %16 : vector<4x1xf32>
    %54 = arith.subf %15, %53 : vector<4x1xf32>
    %55 = arith.addf %54, %17 : vector<4x1xf32>
    %cst_18 = arith.constant 2.000000e+00 : f32
    %56 = vector.broadcast %cst_18 : f32 to vector<4x1xf32>
    %57 = arith.mulf %56, %39 : vector<4x1xf32>
    %58 = arith.mulf %57, %51 : vector<4x1xf32>
    %59 = arith.subf %55, %58 : vector<4x1xf32>
    %60 = arith.mulf %39, %39 : vector<4x1xf32>
    %61 = vector.broadcast %30 : vector<1x1xf32> to vector<4x1xf32>
    %62 = arith.mulf %60, %61 : vector<4x1xf32>
    %63 = arith.addf %59, %62 : vector<4x1xf32>
    %cst_19 = arith.constant 0.000000e+00 : f32
    %64 = vector.broadcast %cst_19 : f32 to vector<4x1xf32>
    %65 = arith.maximumf %47, %64 : vector<4x1xf32>
    %cst_20 = arith.constant 9.99999974E-6 : f32
    %66 = vector.broadcast %cst_20 : f32 to vector<1x1xf32>
    %67 = arith.addf %21, %66 : vector<1x1xf32>
    %68 = vector.broadcast %67 : vector<1x1xf32> to vector<4x1xf32>
    %69 = arith.divf %65, %68 : vector<4x1xf32>
    %cst_21 = arith.constant 0.000000e+00 : f32
    %70 = vector.broadcast %cst_21 : f32 to vector<4x1xf32>
    %71 = arith.maximumf %63, %70 : vector<4x1xf32>
    %cst_22 = arith.constant 9.99999974E-6 : f32
    %72 = vector.broadcast %cst_22 : f32 to vector<1x1xf32>
    %73 = arith.addf %25, %72 : vector<1x1xf32>
    %74 = vector.broadcast %73 : vector<1x1xf32> to vector<4x1xf32>
    %75 = arith.divf %71, %74 : vector<4x1xf32>
    %cst_23 = arith.constant 9.99999974E-6 : f32
    %76 = vector.broadcast %cst_23 : f32 to vector<4x1xf32>
    %77 = arith.addf %75, %76 : vector<4x1xf32>
    %78 = math.sqrt %77 : vector<4x1xf32>
    %cst_24 = arith.constant 9.99999974E-6 : f32
    %79 = vector.broadcast %cst_24 : f32 to vector<4x1xf32>
    %80 = arith.addf %69, %79 : vector<4x1xf32>
    %81 = math.rsqrt %80 : vector<4x1xf32>
    %82 = arith.divf %7, %78 : vector<4x1xf32>
    %83 = arith.mulf %39, %82 : vector<4x1xf32>
    %84 = arith.subf %8, %83 : vector<4x1xf32>
    %85 = arith.mulf %78, %81 : vector<4x1xf32>
    %86 = arith.mulf %5, %85 : vector<4x1xf32>
    %87 = arith.mulf %34, %85 : vector<4x1xf32>
    %88 = arith.subf %39, %87 : vector<4x1xf32>
    %89 = arith.mulf %5, %88 : vector<4x1xf32>
    %90 = arith.addf %89, %6 : vector<4x1xf32>
    %91 = arith.subf %86, %82 : vector<4x1xf32>
    %92 = arith.subf %90, %84 : vector<4x1xf32>
    %93 = vector.extract_strided_slice %3 {offsets = [1, 0], sizes = [1, 256], strides = [1, 1]} : vector<3x256xf32> to vector<1x256xf32>
    %94 = vector.broadcast %82 : vector<4x1xf32> to vector<4x256xf32>
    %95 = arith.mulf %1, %94 : vector<4x256xf32>
    %96 = vector.broadcast %84 : vector<4x1xf32> to vector<4x256xf32>
    %97 = arith.addf %95, %96 : vector<4x256xf32>
    %98 = vector.broadcast %91 : vector<4x1xf32> to vector<4x256xf32>
    %99 = arith.mulf %1, %98 : vector<4x256xf32>
    %100 = vector.broadcast %92 : vector<4x1xf32> to vector<4x256xf32>
    %101 = arith.addf %99, %100 : vector<4x256xf32>
    %102 = vector.broadcast %93 : vector<1x256xf32> to vector<4x256xf32>
    %103 = arith.mulf %102, %101 : vector<4x256xf32>
    %104 = arith.addf %97, %103 : vector<4x256xf32>
    %c0_25 = arith.constant 0 : index
    %c0_26 = arith.constant 0 : index
    %c0_27 = arith.constant 0 : index
    %105 = vector.load %arg5[%c0_25, %c0_26, %c0_27] : memref<1x4x256xf32, #tpu.memory_space<vmem>>, vector<1x4x256xf32>
    %106 = vector.shape_cast %105 : vector<1x4x256xf32> to vector<4x256xf32>
    %107 = vector.shape_cast %104 : vector<4x256xf32> to vector<1x4x256xf32>
    tpu.vector_store %arg5[%c0_25, %c0_26, %c0_27], %107 {strides = array<i32>} : memref<1x4x256xf32, #tpu.memory_space<vmem>>, vector<1x4x256xf32>,
    return
  }
  func.func @transform_0(%arg0: i32, %arg1: i32) -> (i32, i32, i32) {
    %c0_i32 = arith.constant 0 : i32
    %c0_i32_0 = arith.constant 0 : i32
    return %arg0, %arg1, %c0_i32 : i32, i32, i32
  }
  func.func @transform_1(%arg0: i32, %arg1: i32) -> (i32, i32, i32) {
    %c0_i32 = arith.constant 0 : i32
    %c0_i32_0 = arith.constant 0 : i32
    %c0_i32_1 = arith.constant 0 : i32
    return %arg0, %c0_i32, %c0_i32_0 : i32, i32, i32
  }
  func.func @transform_2(%arg0: i32, %arg1: i32) -> (i32, i32) {
    %c0_i32 = arith.constant 0 : i32
    %c0_i32_0 = arith.constant 0 : i32
    %c0_i32_1 = arith.constant 0 : i32
    return %c0_i32, %c0_i32_0 : i32, i32
  }
  func.func @transform_3(%arg0: i32, %arg1: i32) -> (i32, i32, i32) {
    %c0_i32 = arith.constant 0 : i32
    %c0_i32_0 = arith.constant 0 : i32
    return %arg0, %arg1, %c0_i32 : i32, i32, i32
  }
}

</mosaic_0001>

<bundles_post_ra>
// kernel: tpu_custom_call.1
= control target key start
LH: loop header
LB: loop body
LE: loop exit
PB: predicated region body
PF: predicated region fallthrough
CT: control target
= control target key end

     0   :  { %8 = vsyncpa [#allocation3], 0  ;;  %s1091_s0 = inlined_call_operand.vmem [shape: f32[2,4,256], index: 0, kind: input, shape index: {}]   ;;  %s1092_s1 = inlined_call_operand.vmem [shape: f32[2,3,256], index: 1, kind: input, shape index: {}]   ;;  %s1093_s2 = inlined_call_operand.vmem [shape: f32[4,4], index: 2, kind: input, shape index: {}]   ;;  %s1094_s3 = inlined_call_operand.hbm [shape: f32[2,4,256], index: 3, kind: output, shape index: {}]  }
   0x1   :  { %10 = vsyncpa [#allocation3 + $0x1], 0  ;;  %s921_s12 = smov 0   ;;  %s923_s13 = smov 0  }
   0x2   :  { %s925_s14 = smov 0   ;;  %s927_s15 = smov 0  }
   0x3   :  { %s929_s16 = smov 0   ;;  %s931_s17 = smov 0  }
   0x4 LB: > { %s712_s18 = sadd.s32 4294967295, %s888_s17   ;;  %s713_s19 = sadd.s32 4294967294, %s888_s17   ;;  %s888_s17 = sphi %s931_s17, %s16_s17   ;;  %s884_s16 = sphi %s929_s16, %s1101_s16   ;;  %s880_s15 = sphi %s927_s15, %s1100_s15   ;;  %s876_s14 = sphi %s925_s14, %s1099_s14   ;;  %s872_s13 = sphi %s923_s13, %s1098_s13   ;;  %s868_s12 = sphi %s921_s12, %s1097_s12  }
   0x5   : > { %s28_s20 = sadd.s32 1, %s884_s16  ;;  %s112_s21 = sadd.s32 1, %s876_s14 }
   0x6   : > { %p30_p0 = scmp.ge.s32.totalorder %s28_s20, 2  ;;  %p122_p1 = scmp.ne.s32.totalorder %s876_s14, %s872_s13 }
   0x7   : > { %p123_p2 = scmp.eq.s32.totalorder %s712_s18, 1  ;;  %p128_p3 = scmp.ne.s32.totalorder %s872_s13, %s868_s12 }
   0x8   : > { %s1103_s20 = smov (%p30_p0, %s28_s20), 0  ;;  %p129_p5 = scmp.eq.s32.totalorder %s713_s19, 1 }
   0x9   : > { %p961_p4 = por %p123_p2, %p122_p1  ;;  %s107_s23 = ssub.s32 %s884_s16, %s1103_s20 }
   0xa   : > { %p716_p6 = scmp.ge.s32.totalorder %s888_s17, 1  ;;  %p110_p7 = scmp.eq.s32.totalorder %s107_s23, 0 }
   0xb   : > { %p968_p8 = por %p129_p5, %p128_p3  ;;  %p170_p9 = scmp.lt.s32.totalorder %s888_s17, 3 }
   0xc   : > { %s974_s25 = scalar_select %p110_p7, %s876_s14, %s112_s21  }
   0xd   : > { %p171_p10 = pnand %p716_p6, %p170_p9 }
   0xe   : > { %p203_p11 = scmp.lt.s32.totalorder (!%p171_p10), %s880_s15, 1  ;;  %s890_s7 = smov (!%p171_p10), 126  }
   0xf   : > { %174 = sbr.rel (%p171_p10) target bundleno = 1013 (0x3f5), region = 32  ;;  %s891_s8 = smov (!%p171_p10), 127  }
  0x10   : > { %s892_s9 = smov (!%p171_p10), 1   ;;  %s893_s10 = smov (!%p171_p10), 2  }
  0x11   : > { %s895_s19 = smov (!%p171_p10), 3   ;;  %s897_s21 = smov (!%p171_p10), 125  }
  0x12   : > { %s200_s23 = sand.u32 (!%p171_p10), 1, %s872_s13  }
  0x14   : > { %v370_v0 = vlaneseq  ;;  %s204_s26 = scalar_select %p203_p11, %s880_s15, 1  ;;  %vm380_vm0 = vcmask 1041409   ;;  %vm396_vm1 = vcmask 1042434  }
  0x16   : > { %v978_v1 = vshrl.u32 %v370_v0, 7  ;;  %s727_s27 = sshll.u32 %s204_s26, 3  ;;  %s717_s26 = sshll.u32 %s200_s23, 3 }
  0x17   : > { %s216_s30 = scalar_lea.vmem %s1092_s1, %s727_s27  ;;  %s211_s6 = scalar_lea.vmem %s1091_s0, %s727_s27 }
  0x18   : > { %v981_v2 = vsub.s32 1, %v978_v1  ;;  %v376_v3 = vsub.s32 5, %v978_v1  ;;  %v388_v4 = vsub.s32 2, %v978_v1  ;;  %v392_v5 = vsub.s32 6, %v978_v1  ;;  %v218_v6 = vld [vmem:[%s216_s30] sm:$0x77] }
  0x19   : > { %v992_v7 = vld [vmem:[%s211_s6] sm:$0xff]  ;;  %v224_v8 = vcombine.high %v218_v6, %v218_v6  ;;  %s729_s27 = sshll.u32 %s880_s15, 7  ;;  %s202_s28 = scalar_lea.vmem [#allocation2], %s717_s26 }
  0x1a   : > { %v221_v9 = vcombine.high %v992_v7, %v992_v7  ;;  %v296_v10 = vmul.f32 %v992_v7, %v992_v7  ;;  %v999_v11 = vrot.slane %v218_v6, %v981_v2  ;;  %v1001_v12 = vrot.slane %v218_v6, %v376_v3  ;;  %s621_s29 = sshll.u32 %s202_s28, 4  ;;  %s619_s5 = scalar_lea.hbm %s1094_s3, %s729_s27  ;;  %s622_s29 = int_to_ptr.vmem [resolvable:$true] %s621_s29 }
  0x1b   : > { %v389_v13 = vrot.slane %v218_v6, %v388_v4  ;;  %v393_v14 = vrot.slane %v218_v6, %v392_v5  ;;  %256 = vmatprep.subr.mxu0 %v224_v8  ;;  %330 = vmatprep.subr.mxu1 %v224_v8  ;;  %s605_s6 = scalar_lea.sflag [#allocation3], %s200_s23 }
  0x1c   : > { %290 = vmatprep.mubr.f32.mxu0 %v221_v9  ;;  %v298_v15 = vcombine.high %v296_v10, %v296_v10  ;;  %v381_v16 = vsel %vm380_vm0, %v999_v11, 0.0  ;;  %257 = vmatpush1.xpose.msra.mxu0 %v218_v6  ;;  %v382_v17 = vsel %vm380_vm0, %v1001_v12, 0.0 }
  0x1d   : > { %v397_v18 = vsel %vm396_vm1, %v389_v13, 0.0  ;;  %v398_v19 = vsel %vm396_vm1, %v393_v14, 0.0  ;;  %331 = vmatpush1.xpose.msra.mxu1 %v218_v6  ;;  %v383_v20 = vadd.f32 %v382_v17, %v381_v16 }
  0x1e   : > { %364 = vmatprep.mubr.f32.mxu1 %v298_v15  ;;  %v399_v21 = vadd.f32 %v398_v19, %v397_v18 }
  0x1f   : > { %291 = vmatmul.mubr.f32.vlgmr.msra.gmra.mxu0 %v992_v7  ;;  %384 = vadd.xlane.f32.xlu0 %v383_v20 }
  0x20   : > { %365 = vmatmul.mubr.f32.vlgmr.msra.gmra.mxu1 %v296_v10 }
  0x23   : > { %400 = vadd.xlane.f32.xlu0 %v399_v21 }
  0xa8   : > { %v385_v28 = vpop.xlane.xlu0 %384 }
  0xa9   : > { %v409_v29 = vadd.f32 1e-05, %v385_v28  ;;  %v402_v31 = vsub.f32 256.0, %v385_v28  ;;  %v403_v39 = vmul.f32 2.0, %v385_v28 }
  0xab   : > { %v413_v30 = vrot.slane %v409_v29, %v981_v2  ;;  %v421_v32 = vadd.f32 1e-05, %v402_v31  ;;  %v404_v46 = vsub.f32 256.0, %v403_v39 }
  0xac   : > { %v401_v36 = vpop.xlane.xlu0 %400 }
  0xad   : > { %802 = vrcp.f32 %v413_v30  ;;  %v425_v33 = vrot.slane %v421_v32, %v981_v2  ;;  %v439_v41 = vrot.slane %v401_v36, %v388_v4  ;;  %v406_v47 = vrot.slane %v401_v36, 1 }
  0xaf   : > { %804 = vrcp.f32 %v425_v33  ;;  %v408_v53 = vadd.f32 %v406_v47, %v404_v46  ;;  %v896_v33 = vmov 3   ;;  %v898_v46 = vmov 2  }
  0xb1   : > { %v474_v59 = vrot.slane %v408_v53, %v981_v2 }
  0xba   : > { %v803_v34 = vpop.eup %802 }
  0xbc   : > { %v805_v44 = vpop.eup %804 }
  0xdf   : > { %v292_v22 = vpop.f32.mrf.mxu0 }
  0xe0   : > { %452 = vrot.lane.b32.xlu0 %v292_v22, %s890_s7  ;;  %417 = vrot.lane.b32.xlu1 %v292_v22, %s891_s8  ;;  %v1010_v23 = vpop.f32.mrf.mxu1  ;;  %v446_v25 = vmul.f32 2.0, %v292_v22  ;;  %v1019_v35 = vmul.f32 %v803_v34, %v292_v22 }
  0xe1   : > { %v294_v24 = vpop.f32.mrf.mxu0  ;;  %v456_v27 = vmul.f32 2.0, %v1010_v23 }
  0xe2   : > { %v368_v26 = vpop.f32.mrf.mxu1  ;;  %v428_v37 = vmul.f32 2.0, %v1019_v35  ;;  %v435_v40 = vmul.f32 %v1019_v35, %v1019_v35  ;;  %v894_v24 = vmov 0  }
  0xe3   : > { %795 = vset.pattern.permute.xlu0 %v894_v24  ;;  %796 = vset.pattern.permute.xlu1 %v894_v24 }
  0xe4   : > { %448 = vrot.lane.b32.xlu1 %v446_v25, %s891_s8  ;;  %v440_v48 = vmul.f32 %v439_v41, %v435_v40  ;;  %v219_v25 = vld [vmem:[%s1093_s2] sm:$0xf] }
  0xe8   : > { %458 = vrot.lane.b32.xlu1 %v456_v27, %s891_s8 }
  0xec   : > { %463 = vrot.lane.b32.xlu1 %v1010_v23, %s890_s7 }
 0x152   : > { %v418_v38 = vpop.permute.xlu1 %417  ;;  %v453_v51 = vpop.permute.xlu0 %452 }
 0x153   : > { %v429_v42 = vmul.f32 %v428_v37, %v418_v38  ;;  %v420_v43 = vsub.f32 %v292_v22, %v418_v38 }
 0x155   : > { %431 = vrot.lane.b32.xlu1 %v429_v42, %s892_s9  ;;  %v1025_v50 = vmul.f32 %v805_v44, %v420_v43 }
 0x156   : > { %v449_v45 = vpop.permute.xlu1 %448 }
 0x157   : > { %v451_v49 = vsub.f32 %v292_v22, %v449_v45  ;;  %v467_v56 = vmul.f32 2.0, %v1025_v50  ;;  %v470_v57 = vmul.f32 %v1025_v50, %v1025_v50 }
 0x159   : > { %442 = vrot.lane.b32.xlu1 %v440_v48, %s892_s9  ;;  %v455_v54 = vadd.f32 %v453_v51, %v451_v49  ;;  %v475_v62 = vmul.f32 %v474_v59, %v470_v57 }
 0x15a   : > { %v459_v52 = vpop.permute.xlu1 %458 }
 0x15b   : > { %v461_v55 = vsub.f32 %v1010_v23, %v459_v52  ;;  %v468_v60 = vmul.f32 %v467_v56, %v455_v54  ;;  %v592_v56 = vrot.slane %v1001_v12, %v981_v2 }
 0x15e   : > { %v464_v58 = vpop.permute.xlu1 %463 }
 0x15f   : > { %v466_v61 = vadd.f32 %v464_v58, %v461_v55  ;;  %v588_v55 = vrot.slane %v999_v11, %v981_v2 }
 0x161   : > { %v469_v63 = vsub.f32 %v466_v61, %v468_v60 }
 0x163   : > { %v476_v0 = vadd.f32 %v475_v62, %v469_v63 }
 0x165   : > { %v479_v3 = vmax.f32 %v476_v0, 0.0 }
 0x167   : > { %v480_v4 = vmul.f32 %v805_v44, %v479_v3 }
 0x169   : > { %v481_v5 = vadd.f32 1e-05, %v480_v4 }
 0x16b   : > { %806 = vrsqrt.f32 %v481_v5  ;;  %vm484_vm2 = vcmp.eq.f32.partialorder %v481_v5, inf  ;;  %v487_v9 = vand.u32 2147483648, %v481_v5  ;;  %vm486_vm3 = vcmp.eq.f32.partialorder %v481_v5, 0.0 }
 0x178   : > { %v807_v6 = vpop.eup %806 }
 0x179   : > { %v483_v8 = vmul.f32 %v807_v6, %v481_v5 }
 0x17b   : > { %v485_v10 = vsel %vm484_vm2, %v481_v5, %v483_v8 }
 0x17c   : > { %v488_v13 = vsel %vm486_vm3, %v487_v9, %v485_v10 }
 0x17d   : > { %492 = vrot.lane.b32.xlu1 %v488_v13, %s893_s10 }
 0x1c7   : > { %v432_v14 = vpop.permute.xlu1 %431 }
 0x1c8   : > { %v434_v15 = vsub.f32 %v1010_v23, %v432_v14 }
 0x1cb   : > { %v443_v16 = vpop.permute.xlu1 %442 }
 0x1cc   : > { %v445_v17 = vadd.f32 %v443_v16, %v434_v15 }
 0x1ce   : > { %v477_v18 = vmax.f32 %v445_v17, 0.0 }
 0x1d0   : > { %v478_v19 = vmul.f32 %v803_v34, %v477_v18 }
 0x1d2   : > { %v489_v20 = vadd.f32 1e-05, %v478_v19 }
 0x1d4   : > { %808 = vrsqrt.f32 %v489_v20 }
 0x1e1   : > { %v809_v21 = vpop.eup %808 }
 0x1e2   : > { %508 = vrot.lane.b32.xlu1 %v809_v21, %s890_s7 }
 0x1ef   : > { %v493_v22 = vpop.permute.xlu1 %492 }
 0x1f0   : > { %810 = vrcp.f32 %v493_v22 }
 0x1fd   : > { %v811_v26 = vpop.eup %810 }
 0x1fe   : > { %v496_v23 = vmul.f32 %v811_v26, %v219_v25 }
 0x200   : > { %498 = vrot.lane.b32.xlu0 %v496_v23, %s890_s7  ;;  %s812_s7 = scalar_lea.vmem %s622_s29, 128 }
 0x201   : > { %p813_p12 = scmp.ne.s32.totalorder %s622_s29, %s812_s7 }
 0x203   : > { %p814_p13 = pnand %p813_p12, %p961_p4 }
 0x205   : > { %p815_p0 = pneg %p814_p13 }
 0x254   : > { %v509_v27 = vpop.permute.xlu1 %508 }
 0x255   : > { %v511_v28 = vmul.f32 %v509_v27, %v488_v13 }
 0x257   : > { %514 = vrot.lane.b32.xlu1 %v511_v28, %s892_s9  ;;  %v512_v31 = vmul.f32 %v511_v28, %v219_v25 }
 0x272   : > { %v499_v29 = vpop.permute.xlu0 %498 }
 0x273   : > { %v501_v30 = vmul.f32 %v499_v29, %v1025_v50  ;;  %v529_v32 = vsub.f32 %v512_v31, %v499_v29 }
 0x275   : > { %503 = vrot.lane.b32.xlu0 %v501_v30, %s895_s19 }
 0x279   : > { %525 = vrot.lane.b32.xlu0 %v219_v25, %s891_s8 }
 0x27d   : > { %561 = vperm.xlu0 %795, %v529_v32  }
 0x281   : > { %798 = vset.pattern.permute.xlu0 %v896_v33 }
 0x2c9   : > { %v515_v34 = vpop.permute.xlu1 %514 }
 0x2ca   : > { %v517_v36 = vmul.f32 %v515_v34, %v1019_v35  ;;  %v899_v35 = vmov 839922192  }
 0x2cb   : > { %v539_v47 = vunpack.c.l.s4 %v899_v35 }
 0x2cc   : > { %519 = vrot.lane.b32.xlu1 %v517_v36, %s891_s8  ;;  %s900_s8 = smov [#allocation2]  }
 0x2cd   : > { %v540_v48 = vunpack.c.0.s8 %v539_v47  ;;  %s816_s9 = sshll.u32 %s900_s8, 4  ;;  %s817_s9 = int_to_ptr.vmem [resolvable:$false] %s816_s9 }
 0x2ce   : > { %s818_s15 = scalar_lea.vmem %s817_s9, 256  ;;  %p819_p1 = scmp.lt.s32.totalorder %s622_s29, %s817_s9 }
 0x2cf   : > { %v543_v49 = vsub.s32 %v540_v48, %v978_v1  ;;  %p820_p2 = scmp.lt.s32.totalorder %s818_s15, %s812_s7 }
 0x2d1   : > { %p821_p3 = por %p820_p2, %p819_p1 }
 0x2d3   : > { %p822_p5 = pnand %p821_p3, %p815_p0 }
 0x2e7   : > { %v504_v37 = vpop.permute.xlu0 %503 }
 0x2e8   : > { %v506_v38 = vsub.f32 %v219_v25, %v504_v37 }
 0x2ea   : > { %531 = vrot.lane.b32.xlu1 %v506_v38, %s897_s21  ;;  %548 = vperm.xlu0 %798, %v506_v38  }
 0x2eb   : > { %v526_v42 = vpop.permute.xlu0 %525 }
 0x2ee   : > { %799 = vset.pattern.permute.xlu0 %v894_v24 }
 0x2f8   : > { %v562_v51 = vpop.permute.xlu0 %561 }
 0x2f9   : > { %v569_v52 = vrot.slane %v562_v51, %v543_v49 }
 0x33e   : > { %v520_v39 = vpop.permute.xlu1 %519 }
 0x33f   : > { %v522_v40 = vsub.f32 %v1025_v50, %v520_v39  ;;  %v571_v50 = vmul.f32 %v569_v52, %v992_v7 }
 0x341   : > { %v523_v41 = vmul.f32 %v522_v40, %v219_v25 }
 0x343   : > { %v528_v43 = vadd.f32 %v526_v42, %v523_v41 }
 0x35c   : > { %v532_v44 = vpop.permute.xlu1 %531 }
 0x35d   : > { %v534_v45 = vsub.f32 %v528_v43, %v532_v44 }
 0x35f   : > { %574 = vperm.xlu1 %796, %v534_v45  }
 0x363   : > { %797 = vset.pattern.permute.xlu1 %v898_v46 }
 0x364   : > { %536 = vperm.xlu1 %797, %v496_v23  }
 0x365   : > { %v549_v58 = vpop.permute.xlu0 %548 }
 0x366   : > { %v556_v63 = vrot.slane %v549_v58, %v543_v49 }
 0x3da   : > { %v575_v53 = vpop.permute.xlu1 %574 }
 0x3db   : > { %v582_v54 = vrot.slane %v575_v53, %v543_v49 }
 0x3dd   : > { %v584_v57 = vadd.f32 %v582_v54, %v571_v50 }
 0x3df   : > { %v594_v59 = vcombine.high %v584_v57, %v584_v57  ;;  %v537_v60 = vpop.permute.xlu1 %536  ;;  %v596_v61 = vmul.f32 %v588_v55, %v584_v57 }
 0x3e0   : > { %v544_v1 = vrot.slane %v537_v60, %v543_v49 }
 0x3e1   : > { %v597_v62 = vmul.f32 %v594_v59, %v592_v56 }
 0x3e2   : > { %v546_v0 = vmul.f32 %v544_v1, %v992_v7 }
 0x3e3   : > { %v600_v3 = vcombine.low %v596_v61, %v597_v62 }
 0x3e4   : > { %v558_v11 = vadd.f32 %v556_v63, %v546_v0 }
 0x3e6   : > { %v602_v4 = vadd.f32 %v600_v3, %v558_v11 }
 0x3e8   : > { %603 = vst [vmem:[%s202_s28] sm:$0xff] %v602_v4 }
 0x3e9   : > { %825 = shalt.err (!%p822_p5)
}
 0x3ea   : > { %s826_s10 = scalar_lea.hbm %s619_s5, 128  ;;  %s830_s19 = scalar_lea.hbm %s1094_s3, 256 }
 0x3eb   : > { %p827_p6 = scmp.ne.s32.totalorder %s619_s5, %s826_s10  ;;  %p831_p10 = scmp.lt.s32.totalorder %s619_s5, %s1094_s3 }
 0x3ec   : > { %p832_p11 = scmp.lt.s32.totalorder %s830_s19, %s826_s10 }
 0x3ed   : > { %p828_p7 = pnand %p827_p6, %p961_p4 }
 0x3ee   : > { %p833_p12 = por %p832_p11, %p831_p10 }
 0x3ef   : > { %p829_p9 = pneg %p828_p7 }
 0x3f1   : > { %p834_p13 = pnand %p833_p12, %p829_p9 }
 0x3f3   : > { %837 = shalt.err (!%p834_p13)
}
 0x3f4   : > { %730 = dma.vmem_to_hbm [thread:$0]  (%p961_p4), %s622_s29, 128, %s619_s5, %s605_s6  }
 0x3f5 PF: > { %p736_p0 = scmp.ge.s32.totalorder %s888_s17, 2  ;;  %s633_s26 = sand.u32 1, %s868_s12  }
 0x3f6   : > { %s634_s27 = scalar_lea.sflag [#allocation3], %s633_s26 }
 0x3f7   : > { %p733_p1 = pnand %p736_p0, %p968_p8 }
 0x3f9   : > { %p734_p2 = pneg %p733_p1 }
 0x3fb   : > { %863 = dma.done.wait (%p734_p2), %s634_s27, 128  }
 0x3fc   : > { %865 = vsyncadd (%p734_p2), %s634_s27, 4294967168  ;;  %s16_s17 = sadd.s32 1, %s888_s17   ;;  %s1097_s12 = smov %s872_s13 }
 0x3fd   : > { %p13_p3 = scmp.ge.s32.totalorder %s16_s17, 4   ;;  %s1098_s13 = smov %s876_s14 }
 0x3fe   : > { %s1099_s14 = smov %s974_s25  ;;  %s1100_s15 = smov %s884_s16 }
 0x3ff   : > { %s1101_s16 = smov %s1103_s20  ;;  %15 = sbr.rel (!%p13_p3) target bundleno = 4 (0x4), region = 70 }
 0x404   :  { %639 = vsyncpa [#allocation3], 1 }
 0x405   :  { %641 = vsyncpa [#allocation3 + $0x1], 1 }

</bundles_post_ra>
